<compile_context>
chip_gen: v7x
topology: tpu7x:2x2x1
jax: 0.10.0
libtpu: 0.0.40
codegen_flags: <defaults>
</compile_context>

<pallas_src>
import functools
import math

import jax
import jax.numpy as jnp
from jax.experimental import pallas as pl
from jax.experimental.pallas import tpu as pltpu


# ---------------------------------------------------------------------------
# Tiling helpers
# ---------------------------------------------------------------------------

def _round_up(x, m):
    return ((x + m - 1) // m) * m


def _tile_and_pad(dim, pref, *, min_blocks=1, slack=0.03):
    """Return (padded_dim, tile).

    padded_dim is a multiple of tile; tile is a multiple of 128 and <= pref
    (unless the whole dim fits a single 128-padded block).  Picks the largest
    tile whose padding overhead stays within `slack` of the minimal
    128-aligned padding.  min_blocks > 1 caps the tile so the grid axis keeps
    at least that many blocks (both v7x TensorCores stay busy).
    """
    dp_min = _round_up(dim, 128)
    if min_blocks > 1:
        pref = min(pref, max(128, (dp_min // min_blocks) // 128 * 128))
    pref = max(128, (pref // 128) * 128)
    if dp_min <= pref:
        return dp_min, dp_min
    best_pad, best_tile = dp_min, 128
    t = 128
    while t <= pref:
        padded = _round_up(dim, t)
        if padded <= dp_min * (1.0 + slack):
            best_pad, best_tile = padded, t
        t += 128
    return best_pad, best_tile


# ---------------------------------------------------------------------------
# Kernel factory
# ---------------------------------------------------------------------------

def _make_mm_kernel(*, dot_dtype, tk, b_slice, has_bias, acc_in_out):
    """Tiled matmul kernel: one (tm, tn) output tile, K-axis reduction.

    dot_dtype : MXU operand dtype; tiles are cast in-register if needed.
    b_slice   : B block spans the full K dim (resident); slice the k-th slab.
    has_bias  : add a (1, tn) f32 bias row in the k==last epilogue.
    acc_in_out: accumulate directly into the (f32, k-invariant) output block.
    """

    def kernel(*refs):
        idx = 0
        a_ref = refs[idx]; idx += 1
        b_ref = refs[idx]; idx += 1
        bias_ref = None
        if has_bias:
            bias_ref = refs[idx]; idx += 1
        o_ref = refs[idx]; idx += 1
        acc_ref = o_ref if acc_in_out else refs[idx]

        k = pl.program_id(2)

        @pl.when(k == 0)
        def _init():
            acc_ref[...] = jnp.zeros_like(acc_ref)

        a = a_ref[...]
        if a.dtype != dot_dtype:
            a = a.astype(dot_dtype)

        if b_slice:
            off = pl.multiple_of(k * tk, 128)
            b = b_ref[pl.ds(off, tk), :]
        else:
            b = b_ref[...]
        if b.dtype != dot_dtype:
            b = b.astype(dot_dtype)

        acc_ref[...] += jnp.dot(a, b, preferred_element_type=jnp.float32)

        if has_bias or not acc_in_out:
            @pl.when(k == pl.num_programs(2) - 1)
            def _finalize():
                res = acc_ref[...]
                if has_bias:
                    res = res + bias_ref[...]
                o_ref[...] = res.astype(o_ref.dtype)

    return kernel


# ---------------------------------------------------------------------------
# Matmul wrapper
# ---------------------------------------------------------------------------

def _pallas_matmul(a, b, bias=None, *, out_dtype, dot_dtype=jnp.bfloat16,
                   tm_pref=512, tn_pref=512, tk_pref=2048,
                   min_m_blocks=2, b_resident_budget=16 * 2**20):
    """out = a @ b (+ bias), tiled on the MXU via Pallas.

    a    : [M, K]   streamed tile-by-tile; cast to dot_dtype in-kernel.
    b    : [K, N]   kept fully VMEM-resident along K when it fits the budget.
    bias : [N] or None (added in f32 in the epilogue).
    """
    M, K = a.shape
    K2, N = b.shape
    assert K == K2
    out_dtype = jnp.dtype(out_dtype)
    dot_dtype = jnp.dtype(dot_dtype)

    Mp, tm = _tile_and_pad(M, tm_pref, min_blocks=min_m_blocks)
    Np, tn = _tile_and_pad(N, tn_pref)
    Kp, tk = _tile_and_pad(K, tk_pref)
    gm, gn, gk = Mp // tm, Np // tn, Kp // tk

    a_p = a if (Mp, Kp) == (M, K) else jnp.pad(a, ((0, Mp - M), (0, Kp - K)))
    b_p = b if (Kp, Np) == (K, N) else jnp.pad(b, ((0, Kp - K), (0, Np - N)))

    a_itemsize = jnp.dtype(a.dtype).itemsize
    b_itemsize = jnp.dtype(b.dtype).itemsize

    # Keep the (small) B operand VMEM-resident across the whole K axis; with a
    # single N block it is then DMA'd exactly once for the whole kernel.
    b_resident = (2 * Kp * tn * b_itemsize) <= b_resident_budget
    acc_in_out = out_dtype == jnp.dtype(jnp.float32)
    has_bias = bias is not None

    in_specs = [pl.BlockSpec((tm, tk), lambda i, j, k: (i, k))]
    if b_resident:
        in_specs.append(pl.BlockSpec((Kp, tn), lambda i, j, k: (0, j)))
    else:
        in_specs.append(pl.BlockSpec((tk, tn), lambda i, j, k: (k, j)))
    args = [a_p, b_p]
    if has_bias:
        bias_row = bias.astype(jnp.float32).reshape(1, N)
        if Np != N:
            bias_row = jnp.pad(bias_row, ((0, 0), (0, Np - N)))
        in_specs.append(pl.BlockSpec((1, tn), lambda i, j, k: (0, j)))
        args.append(bias_row)

    scratch_shapes = [] if acc_in_out else [pltpu.VMEM((tm, tn), jnp.float32)]

    # Double-buffered block footprint + accumulator, with slack for Mosaic's
    # internal scratch; capped under v7x's 64 MiB physical VMEM.
    vmem_needed = (2 * tm * tk * a_itemsize
                   + 2 * (Kp if b_resident else tk) * tn * b_itemsize
                   + 2 * tm * tn * out_dtype.itemsize
                   + (2 * tn * 4 if has_bias else 0)
                   + (0 if acc_in_out else tm * tn * 4))
    vmem_limit = int(min(max(2 * vmem_needed, 32 * 2**20), 48 * 2**20))

    # Real grid traffic: A re-read per N block; B re-read per M block unless
    # it stays resident for the whole grid (gn == 1).
    a_bytes = Mp * Kp * a_itemsize * gn
    b_bytes = Kp * Np * b_itemsize * (1 if (b_resident and gn == 1) else gm)
    cost = pl.CostEstimate(
        flops=2 * Mp * Np * Kp,
        transcendentals=0,
        bytes_accessed=a_bytes + b_bytes + Mp * Np * out_dtype.itemsize,
    )

    kernel = _make_mm_kernel(dot_dtype=dot_dtype, tk=tk,
                             b_slice=b_resident and Kp > tk,
                             has_bias=has_bias, acc_in_out=acc_in_out)

    out = pl.pallas_call(
        kernel,
        out_shape=jax.ShapeDtypeStruct((Mp, Np), out_dtype),
        grid_spec=pltpu.PrefetchScalarGridSpec(
            num_scalar_prefetch=0,
            grid=(gm, gn, gk),
            in_specs=in_specs,
            out_specs=pl.BlockSpec((tm, tn), lambda i, j, k: (i, j)),
            scratch_shapes=scratch_shapes,
        ),
        compiler_params=pltpu.CompilerParams(
            dimension_semantics=("parallel", "parallel", "arbitrary"),
            vmem_limit_bytes=vmem_limit,
        ),
        cost_estimate=cost,
    )(*args)

    if (Mp, Np) != (M, N):
        out = out[:M, :N]
    return out


# ---------------------------------------------------------------------------
# GCN layer forward
# ---------------------------------------------------------------------------

@functools.partial(jax.jit, static_argnames=("compute_dtype",))
def graph_convolution_forward(x, adj, weight, bias=None, *,
                              compute_dtype=jnp.bfloat16):
    """Pallas GCN layer: adj @ (x @ weight) + bias.

    compute_dtype is the MXU operand dtype (caller-visible precision knob;
    default bf16).  Operand tiles are cast inside the kernels — no extra HBM
    pass over adj.  Accumulation is always f32; the intermediate `support` is
    stored in compute_dtype; the result is f32.
    """
    # support = x @ weight  (no bias; bf16 intermediate halves its HBM traffic)
    support = _pallas_matmul(x, weight, out_dtype=compute_dtype,
                             dot_dtype=compute_dtype)
    # output = adj @ support (+ bias).  support stays VMEM-resident; adj is
    # streamed in large tiles and cast in-register to compute_dtype.
    return _pallas_matmul(adj, support, bias=bias, out_dtype=jnp.float32,
                          dot_dtype=compute_dtype)


def init_gcn_params(key, in_features, out_features, with_bias=True):
    """Mirror GraphConvolution.reset_parameters(): uniform(-stdv, stdv)."""
    stdv = 1.0 / math.sqrt(out_features)
    kw, kb = jax.random.split(key)
    weight = jax.random.uniform(
        kw, (in_features, out_features), jnp.float32, minval=-stdv, maxval=stdv
    )
    bias = (
        jax.random.uniform(kb, (out_features,), jnp.float32, minval=-stdv, maxval=stdv)
        if with_bias
        else None
    )
    return weight, bias


if __name__ == "__main__":
    key = jax.random.PRNGKey(0)
    k_x, k_adj, k_p = jax.random.split(key, 3)

    # Deliberately non-tile-aligned small shapes to exercise the padding path.
    N = 200        # number of graph nodes
    F_IN = 96      # input feature dim
    F_OUT = 48     # output feature dim

    x = jax.random.normal(k_x, (N, F_IN), dtype=jnp.float32)

    # Dense symmetric "normalized adjacency"-like matrix (synthetic).
    a_raw = (jax.random.uniform(k_adj, (N, N)) < 0.05).astype(jnp.float32)
    a_sym = jnp.maximum(a_raw, a_raw.T) + jnp.eye(N, dtype=jnp.float32)
    deg = jnp.sum(a_sym, axis=1, keepdims=True)
    adj = a_sym / deg  # row-normalized

    weight, bias = init_gcn_params(k_p, F_IN, F_OUT, with_bias=True)

    out = graph_convolution_forward(x, adj, weight, bias)
    out = jax.block_until_ready(out)
    assert out.shape == (N, F_OUT)

    # Reference 1: bf16-quantized reference (matches the kernel's numerics).
    xq = x.astype(jnp.bfloat16).astype(jnp.float32)
    wq = weight.astype(jnp.bfloat16).astype(jnp.float32)
    aq = adj.astype(jnp.bfloat16).astype(jnp.float32)
    sup_q = jnp.dot(xq, wq, precision="highest").astype(jnp.bfloat16).astype(jnp.float32)
    ref_q = jnp.dot(aq, sup_q, precision="highest") + bias[None, :]
    assert jnp.allclose(out, ref_q, atol=2e-3, rtol=2e-3)

    # Reference 2: full-f32 reference (loose tolerance due to bf16 operands).
    ref_f32 = jnp.dot(adj, jnp.dot(x, weight, precision="highest"),
                      precision="highest") + bias[None, :]
    assert jnp.allclose(out, ref_f32, atol=5e-2, rtol=5e-2)

    print("KERNEL_OK")
</pallas_src>

<mosaic_0001>
module attributes {stable_mosaic.version = 11 : i64} {
  func.func @kernel(%arg0: i32, %arg1: i32, %arg2: i32, %arg3: memref<128x128xf32, #tpu.memory_space<vmem>>, %arg4: memref<128x128xf32, #tpu.memory_space<vmem>>, %arg5: memref<128x128xbf16, #tpu.memory_space<vmem>>, %arg6: memref<128x128xf32, #tpu.memory_space<vmem>>) attributes {dimension_semantics = [#tpu.dimension_semantics<parallel>, #tpu.dimension_semantics<parallel>, #tpu.dimension_semantics<arbitrary>], iteration_bounds = array<i64: 2, 1, 1>, scalar_prefetch = 0 : i64, scratch_operands = 1 : i64, tpu.core_type = #tpu.core_type<tc>, window_params = [{transform_indices = @transform_0, window_bounds = array<i64: 128, 128>}, {transform_indices = @transform_1, window_bounds = array<i64: 128, 128>}, {transform_indices = @transform_2, window_bounds = array<i64: 128, 128>}]} {
    %c0_i32 = arith.constant 0 : i32
    %0 = arith.cmpi eq, %arg2, %c0_i32 : i32
    %1 = arith.extui %0 : i1 to i32
    %c0_i32_0 = arith.constant 0 : i32
    %2 = arith.cmpi ne, %1, %c0_i32_0 : i32
    scf.if %2 {
      %cst_10 = arith.constant 0.000000e+00 : f32
      %14 = vector.broadcast %cst_10 : f32 to vector<128x128xf32>
      %c0_11 = arith.constant 0 : index
      %c0_12 = arith.constant 0 : index
      %15 = vector.load %arg6[%c0_11, %c0_12] : memref<128x128xf32, #tpu.memory_space<vmem>>, vector<128x128xf32>
      tpu.vector_store %arg6[%c0_11, %c0_12], %14 {strides = array<i32>} : memref<128x128xf32, #tpu.memory_space<vmem>>, vector<128x128xf32>,
    } else {
    }
    %c0 = arith.constant 0 : index
    %c0_1 = arith.constant 0 : index
    %3 = vector.load %arg3[%c0, %c0_1] : memref<128x128xf32, #tpu.memory_space<vmem>>, vector<128x128xf32>
    %4 = arith.truncf %3 : vector<128x128xf32> to vector<128x128xbf16>
    %c0_2 = arith.constant 0 : index
    %c0_3 = arith.constant 0 : index
    %5 = vector.load %arg4[%c0_2, %c0_3] : memref<128x128xf32, #tpu.memory_space<vmem>>, vector<128x128xf32>
    %6 = arith.truncf %5 : vector<128x128xf32> to vector<128x128xbf16>
    %c0_4 = arith.constant 0 : index
    %c0_5 = arith.constant 0 : index
    %7 = vector.load %arg6[%c0_4, %c0_5] : memref<128x128xf32, #tpu.memory_space<vmem>>, vector<128x128xf32>
    %cst = arith.constant dense<0.000000e+00> : vector<128x128xf32>
    %8 = tpu.matmul %4, %6, %cst {dimension_numbers = #tpu.dot_dimension_numbers<[1], [0], [0], [1], [0, 0, 1, 1], [], []>} : vector<128x128xbf16>, vector<128x128xbf16>, vector<128x128xf32> -> vector<128x128xf32>
    %9 = arith.addf %7, %8 : vector<128x128xf32>
    %c0_6 = arith.constant 0 : index
    %c0_7 = arith.constant 0 : index
    %10 = vector.load %arg6[%c0_6, %c0_7] : memref<128x128xf32, #tpu.memory_space<vmem>>, vector<128x128xf32>
    tpu.vector_store %arg6[%c0_6, %c0_7], %9 {strides = array<i32>} : memref<128x128xf32, #tpu.memory_space<vmem>>, vector<128x128xf32>,
    %c0_i32_8 = arith.constant 0 : i32
    %11 = arith.cmpi eq, %arg2, %c0_i32_8 : i32
    %12 = arith.extui %11 : i1 to i32
    %c0_i32_9 = arith.constant 0 : i32
    %13 = arith.cmpi ne, %12, %c0_i32_9 : i32
    scf.if %13 {
      %c0_10 = arith.constant 0 : index
      %c0_11 = arith.constant 0 : index
      %14 = vector.load %arg6[%c0_10, %c0_11] : memref<128x128xf32, #tpu.memory_space<vmem>>, vector<128x128xf32>
      %15 = arith.truncf %14 : vector<128x128xf32> to vector<128x128xbf16>
      %c0_12 = arith.constant 0 : index
      %c0_13 = arith.constant 0 : index
      %16 = vector.load %arg5[%c0_12, %c0_13] : memref<128x128xbf16, #tpu.memory_space<vmem>>, vector<128x128xbf16>
      tpu.vector_store %arg5[%c0_12, %c0_13], %15 {strides = array<i32>} : memref<128x128xbf16, #tpu.memory_space<vmem>>, vector<128x128xbf16>,
    } else {
    }
    return
  }
  func.func @transform_0(%arg0: i32, %arg1: i32, %arg2: i32) -> (i32, i32) {
    %c0_i32 = arith.constant 0 : i32
    return %arg0, %arg2 : i32, i32
  }
  func.func @transform_1(%arg0: i32, %arg1: i32, %arg2: i32) -> (i32, i32) {
    %c0_i32 = arith.constant 0 : i32
    %c0_i32_0 = arith.constant 0 : i32
    return %c0_i32, %arg1 : i32, i32
  }
  func.func @transform_2(%arg0: i32, %arg1: i32, %arg2: i32) -> (i32, i32) {
    %c0_i32 = arith.constant 0 : i32
    return %arg0, %arg1 : i32, i32
  }
}

module attributes {stable_mosaic.version = 11 : i64} {
  func.func @kernel(%arg0: i32, %arg1: i32, %arg2: i32, %arg3: memref<128x256xf32, #tpu.memory_space<vmem>>, %arg4: memref<256x128xbf16, #tpu.memory_space<vmem>>, %arg5: memref<1x128xf32, #tpu.memory_space<vmem>>, %arg6: memref<128x128xf32, #tpu.memory_space<vmem>>) attributes {dimension_semantics = [#tpu.dimension_semantics<parallel>, #tpu.dimension_semantics<parallel>, #tpu.dimension_semantics<arbitrary>], iteration_bounds = array<i64: 2, 1, 1>, scalar_prefetch = 0 : i64, scratch_operands = 0 : i64, tpu.core_type = #tpu.core_type<tc>, window_params = [{transform_indices = @transform_0, window_bounds = array<i64: 128, 256>}, {transform_indices = @transform_1, window_bounds = array<i64: 256, 128>}, {transform_indices = @transform_2, window_bounds = array<i64: 1, 128>}, {transform_indices = @transform_3, window_bounds = array<i64: 128, 128>}]} {
    %c0_i32 = arith.constant 0 : i32
    %0 = arith.cmpi eq, %arg2, %c0_i32 : i32
    %1 = arith.extui %0 : i1 to i32
    %c0_i32_0 = arith.constant 0 : i32
    %2 = arith.cmpi ne, %1, %c0_i32_0 : i32
    scf.if %2 {
      %cst_10 = arith.constant 0.000000e+00 : f32
      %13 = vector.broadcast %cst_10 : f32 to vector<128x128xf32>
      %c0_11 = arith.constant 0 : index
      %c0_12 = arith.constant 0 : index
      %14 = vector.load %arg6[%c0_11, %c0_12] : memref<128x128xf32, #tpu.memory_space<vmem>>, vector<128x128xf32>
      tpu.vector_store %arg6[%c0_11, %c0_12], %13 {strides = array<i32>} : memref<128x128xf32, #tpu.memory_space<vmem>>, vector<128x128xf32>,
    } else {
    }
    %c0 = arith.constant 0 : index
    %c0_1 = arith.constant 0 : index
    %3 = vector.load %arg3[%c0, %c0_1] : memref<128x256xf32, #tpu.memory_space<vmem>>, vector<128x256xf32>
    %4 = arith.truncf %3 : vector<128x256xf32> to vector<128x256xbf16>
    %c0_2 = arith.constant 0 : index
    %c0_3 = arith.constant 0 : index
    %5 = vector.load %arg4[%c0_2, %c0_3] : memref<256x128xbf16, #tpu.memory_space<vmem>>, vector<256x128xbf16>
    %c0_4 = arith.constant 0 : index
    %c0_5 = arith.constant 0 : index
    %6 = vector.load %arg6[%c0_4, %c0_5] : memref<128x128xf32, #tpu.memory_space<vmem>>, vector<128x128xf32>
    %cst = arith.constant dense<0.000000e+00> : vector<128x128xf32>
    %7 = tpu.matmul %4, %5, %cst {dimension_numbers = #tpu.dot_dimension_numbers<[1], [0], [0], [1], [0, 0, 1, 1], [], []>} : vector<128x256xbf16>, vector<256x128xbf16>, vector<128x128xf32> -> vector<128x128xf32>
    %8 = arith.addf %6, %7 : vector<128x128xf32>
    %c0_6 = arith.constant 0 : index
    %c0_7 = arith.constant 0 : index
    %9 = vector.load %arg6[%c0_6, %c0_7] : memref<128x128xf32, #tpu.memory_space<vmem>>, vector<128x128xf32>
    tpu.vector_store %arg6[%c0_6, %c0_7], %8 {strides = array<i32>} : memref<128x128xf32, #tpu.memory_space<vmem>>, vector<128x128xf32>,
    %c0_i32_8 = arith.constant 0 : i32
    %10 = arith.cmpi eq, %arg2, %c0_i32_8 : i32
    %11 = arith.extui %10 : i1 to i32
    %c0_i32_9 = arith.constant 0 : i32
    %12 = arith.cmpi ne, %11, %c0_i32_9 : i32
    scf.if %12 {
      %c0_10 = arith.constant 0 : index
      %c0_11 = arith.constant 0 : index
      %13 = vector.load %arg6[%c0_10, %c0_11] : memref<128x128xf32, #tpu.memory_space<vmem>>, vector<128x128xf32>
      %c0_12 = arith.constant 0 : index
      %c0_13 = arith.constant 0 : index
      %14 = vector.load %arg5[%c0_12, %c0_13] : memref<1x128xf32, #tpu.memory_space<vmem>>, vector<1x128xf32>
      %15 = vector.broadcast %14 : vector<1x128xf32> to vector<128x128xf32>
      %16 = arith.addf %13, %15 : vector<128x128xf32>
      %c0_14 = arith.constant 0 : index
      %c0_15 = arith.constant 0 : index
      %17 = vector.load %arg6[%c0_14, %c0_15] : memref<128x128xf32, #tpu.memory_space<vmem>>, vector<128x128xf32>
      tpu.vector_store %arg6[%c0_14, %c0_15], %16 {strides = array<i32>} : memref<128x128xf32, #tpu.memory_space<vmem>>, vector<128x128xf32>,
    } else {
    }
    return
  }
  func.func @transform_0(%arg0: i32, %arg1: i32, %arg2: i32) -> (i32, i32) {
    %c0_i32 = arith.constant 0 : i32
    return %arg0, %arg2 : i32, i32
  }
  func.func @transform_1(%arg0: i32, %arg1: i32, %arg2: i32) -> (i32, i32) {
    %c0_i32 = arith.constant 0 : i32
    %c0_i32_0 = arith.constant 0 : i32
    return %c0_i32, %arg1 : i32, i32
  }
  func.func @transform_2(%arg0: i32, %arg1: i32, %arg2: i32) -> (i32, i32) {
    %c0_i32 = arith.constant 0 : i32
    %c0_i32_0 = arith.constant 0 : i32
    return %c0_i32, %arg1 : i32, i32
  }
  func.func @transform_3(%arg0: i32, %arg1: i32, %arg2: i32) -> (i32, i32) {
    %c0_i32 = arith.constant 0 : i32
    return %arg0, %arg1 : i32, i32
  }
}

</mosaic_0001>

<bundles_post_ra>
// kernel: graph_convolution_forward.2
= control target key start
LH: loop header
LB: loop body
LE: loop exit
PB: predicated region body
PF: predicated region fallthrough
CT: control target
= control target key end

     0   :  { %s829_s9 = smov 0   ;;  %s831_s10 = smov 0   ;;  %s932_s0 = inlined_call_operand.vmem [shape: f32[256,128], index: 0, kind: input, shape index: {}]   ;;  %s933_s1 = inlined_call_operand.vmem [shape: f32[128,128], index: 1, kind: input, shape index: {}]   ;;  %s934_s2 = inlined_call_operand.vmem [shape: bf16[256,128], index: 2, kind: output, shape index: {}]  }
   0x1   :  { %s833_s11 = smov 0  }
   0x2 LB: > { %s31_s12 = sadd.s32 1, %s808_s10  ;;  %p616_p0 = scmp.ge.s32.totalorder %s812_s11, 1  ;;  %s812_s11 = sphi %s833_s11, %s12_s11   ;;  %s808_s10 = sphi %s831_s10, %s936_s10   ;;  %s804_s9 = sphi %s829_s9, %s935_s9  }
   0x3   : > { %p33_p1 = scmp.ge.s32.totalorder %s31_s12, 2  ;;  %p148_p2 = scmp.lt.s32.totalorder %s812_s11, 3 }
   0x5   : > { %s938_s12 = smov (%p33_p1, %s31_s12), 0  ;;  %p149_p3 = pnand %p616_p0, %p148_p2 }
   0x6   : > { %v247_v0 = vld [vmem:[%s933_s1] sm:$0xff] (!%p149_p3)  ;;  %v248_v1 = vld [vmem:[%s933_s1 + $0x8] sm:$0xff] (!%p149_p3)  ;;  %v249_v2 = vld [vmem:[%s933_s1 + $0x10] sm:$0xff] (!%p149_p3)  ;;  %s617_s19 = sshll.u32 (!%p149_p3), %s804_s9, 4 }
   0x7   : > { %152 = sbr.rel (%p149_p3) target bundleno = 267 (0x10b), region = 28  ;;  %v263_v3 = vpack.c.bf16 (!%p149_p3), %v248_v1, %v247_v0  ;;  %v250_v4 = vld [vmem:[%s933_s1 + $0x18] sm:$0xff] (!%p149_p3)  ;;  %p181_p4 = scmp.lt.s32.totalorder (!%p149_p3), %s617_s19, 31  ;;  %v251_v6 = vld [vmem:[%s933_s1 + $0x20] sm:$0xff] (!%p149_p3)  ;;  %v252_v7 = vld [vmem:[%s933_s1 + $0x28] sm:$0xff] (!%p149_p3) }
   0x8   : > { %v264_v5 = vpack.c.bf16 (!%p149_p3), %v250_v4, %v249_v2  ;;  %v265_v8 = vpack.c.bf16 (!%p149_p3), %v252_v7, %v251_v6  ;;  %v253_v9 = vld [vmem:[%s933_s1 + $0x30] sm:$0xff] (!%p149_p3)  ;;  %v254_v10 = vld [vmem:[%s933_s1 + $0x38] sm:$0xff] (!%p149_p3)  ;;  %v255_v18 = vld [vmem:[%s933_s1 + $0x40] sm:$0xff] (!%p149_p3) }
   0x9   : > { %718 = vmatprep.subr.bf16.mxu0 (!%p149_p3), %v263_v3  ;;  %750 = vmatprep.subr.bf16.mxu1 (!%p149_p3), %v263_v3  ;;  %v266_v16 = vpack.c.bf16 (!%p149_p3), %v254_v10, %v253_v9  ;;  %v256_v19 = vld [vmem:[%s933_s1 + $0x48] sm:$0xff] (!%p149_p3)  ;;  %v257_v21 = vld [vmem:[%s933_s1 + $0x50] sm:$0xff] (!%p149_p3)  ;;  %v258_v22 = vld [vmem:[%s933_s1 + $0x58] sm:$0xff] (!%p149_p3) }
   0xa   : > { %719 = vmatpush3.bf16.msra.mxu0 (!%p149_p3), %v263_v3  ;;  %758 = vmatpush3.bf16.msra.mxu1 (!%p149_p3), %v263_v3  ;;  %v267_v20 = vpack.c.bf16 (!%p149_p3), %v256_v19, %v255_v18  ;;  %v268_v23 = vpack.c.bf16 (!%p149_p3), %v258_v22, %v257_v21  ;;  %v259_v24 = vld [vmem:[%s933_s1 + $0x60] sm:$0xff] (!%p149_p3)  ;;  %v260_v25 = vld [vmem:[%s933_s1 + $0x68] sm:$0xff] (!%p149_p3)  ;;  %v261_v27 = vld [vmem:[%s933_s1 + $0x70] sm:$0xff] (!%p149_p3) }
   0xb   : > { %720 = vmatprep.subr.bf16.mxu0 (!%p149_p3), %v264_v5  ;;  %751 = vmatprep.subr.bf16.mxu1 (!%p149_p3), %v264_v5  ;;  %v269_v26 = vpack.c.bf16 (!%p149_p3), %v260_v25, %v259_v24  ;;  %v262_v28 = vld [vmem:[%s933_s1 + $0x78] sm:$0xff] (!%p149_p3) }
   0xc   : > { %v270_v29 = vpack.c.bf16 (!%p149_p3), %v262_v28, %v261_v27 }
   0xe   : > { %s940_s19 = smov (!%p181_p4, %s617_s19), 31  ;;  %721 = vmatpush3.bf16.msra.mxu0 %v264_v5  ;;  %759 = vmatpush3.bf16.msra.mxu1 %v264_v5 }
   0xf   : > { %s618_s26 = sshll.u32 %s940_s19, 3  ;;  %722 = vmatprep.subr.bf16.mxu0 %v265_v8  ;;  %752 = vmatprep.subr.bf16.mxu1 %v265_v8 }
  0x10   : > { %s877_s5 = scalar_lea.vmem %s932_s0, %s618_s26  ;;  %s620_s26 = sshll.u32 %s940_s19, 2 }
  0x11   : > { %v223_v11 = vld [vmem:[%s877_s5] sm:$0xff]  ;;  %v224_v12 = vld [vmem:[%s877_s5 + $0x8] sm:$0xff]  ;;  %v225_v30 = vld [vmem:[%s877_s5 + $0x10] sm:$0xff]  ;;  %s200_s29 = scalar_lea.vmem %s934_s2, %s620_s26 }
  0x12   : > { %v231_v13 = vld [vmem:[%s877_s5 + $0x40] sm:$0xff]  ;;  %v239_v14 = vpack.c.bf16 %v224_v12, %v223_v11  ;;  %v232_v15 = vld [vmem:[%s877_s5 + $0x48] sm:$0xff]  ;;  %723 = vmatpush3.bf16.msra.mxu0 %v265_v8  ;;  %760 = vmatpush3.bf16.msra.mxu1 %v265_v8  ;;  %v226_v31 = vld [vmem:[%s877_s5 + $0x18] sm:$0xff] }
  0x13   : > { %v243_v17 = vpack.c.bf16 %v232_v15, %v231_v13  ;;  %724 = vmatprep.subr.bf16.mxu0 %v266_v16  ;;  %753 = vmatprep.subr.bf16.mxu1 %v266_v16  ;;  %v233_v32 = vld [vmem:[%s877_s5 + $0x50] sm:$0xff]  ;;  %v234_v33 = vld [vmem:[%s877_s5 + $0x58] sm:$0xff]  ;;  %v227_v34 = vld [vmem:[%s877_s5 + $0x20] sm:$0xff]  ;;  %v240_v38 = vpack.c.bf16 %v226_v31, %v225_v30 }
  0x14   : > { %734 = vmatprep.mubr.bf16.mxu0 %v239_v14  ;;  %v228_v35 = vld [vmem:[%s877_s5 + $0x28] sm:$0xff]  ;;  %v235_v36 = vld [vmem:[%s877_s5 + $0x60] sm:$0xff]  ;;  %v244_v39 = vpack.c.bf16 %v234_v33, %v233_v32  ;;  %v229_v42 = vld [vmem:[%s877_s5 + $0x30] sm:$0xff] }
  0x15   : > { %742 = vmatprep.mubr.bf16.mxu1 %v243_v17  ;;  %v236_v37 = vld [vmem:[%s877_s5 + $0x68] sm:$0xff]  ;;  %v241_v40 = vpack.c.bf16 %v228_v35, %v227_v34  ;;  %v230_v43 = vld [vmem:[%s877_s5 + $0x38] sm:$0xff]  ;;  %v237_v44 = vld [vmem:[%s877_s5 + $0x70] sm:$0xff] }
  0x16   : > { %725 = vmatpush3.bf16.msra.mxu0 %v266_v16  ;;  %761 = vmatpush3.bf16.msra.mxu1 %v266_v16  ;;  %v245_v41 = vpack.c.bf16 %v236_v37, %v235_v36  ;;  %v238_v45 = vld [vmem:[%s877_s5 + $0x78] sm:$0xff]  ;;  %v242_v46 = vpack.c.bf16 %v230_v43, %v229_v42 }
  0x17   : > { %726 = vmatprep.subr.bf16.mxu0 %v267_v20  ;;  %754 = vmatprep.subr.bf16.mxu1 %v267_v20  ;;  %v246_v47 = vpack.c.bf16 %v238_v45, %v237_v44 }
  0x1a   : > { %727 = vmatpush3.bf16.msra.mxu0 %v267_v20  ;;  %762 = vmatpush3.bf16.msra.mxu1 %v267_v20 }
  0x1b   : > { %728 = vmatprep.subr.bf16.mxu0 %v268_v23  ;;  %755 = vmatprep.subr.bf16.mxu1 %v268_v23 }
  0x1e   : > { %729 = vmatpush3.bf16.msra.mxu0 %v268_v23  ;;  %763 = vmatpush3.bf16.msra.mxu1 %v268_v23 }
  0x1f   : > { %730 = vmatprep.subr.bf16.mxu0 %v269_v26  ;;  %756 = vmatprep.subr.bf16.mxu1 %v269_v26 }
  0x22   : > { %731 = vmatpush3.bf16.msra.mxu0 %v269_v26  ;;  %764 = vmatpush3.bf16.msra.mxu1 %v269_v26 }
  0x23   : > { %732 = vmatprep.subr.bf16.mxu0 %v270_v29  ;;  %757 = vmatprep.subr.bf16.mxu1 %v270_v29 }
  0x26   : > { %733 = vmatpush3.bf16.msra.mxu0 %v270_v29  ;;  %765 = vmatpush3.bf16.msra.mxu1 %v270_v29 }
  0x29   : > { %735 = vmatmul.mubr.bf16.vlgmr.msra.gmra.mrb[0].mxu0 %v240_v38  ;;  %743 = vmatmul.mubr.bf16.vlgmr.msra.gmra.mrb[0].mxu1 %v244_v39 }
  0x2a   : > { %738 = vmatprep.mubr.bf16.mxu0 %v241_v40  ;;  %746 = vmatprep.mubr.bf16.mxu1 %v245_v41 }
  0x31   : > { %739 = vmatmul.mubr.bf16.gmra.mrb[4].mxu0 %v242_v46  ;;  %747 = vmatmul.mubr.bf16.gmra.mrb[4].mxu1 %v246_v47 }
  0xfc   : > { %v736_v48 = vpop.f32.mrb[0].mxu0  ;;  %v744_v49 = vpop.f32.mrb[0].mxu1 }
  0xfd   : > { %v321_v50 = vpop.f32.mrb[1].mxu0  ;;  %v353_v51 = vpop.f32.mrb[1].mxu1 }
  0xfe   : > { %v737_v52 = vpop.f32.mrb[2].mxu0  ;;  %v745_v53 = vpop.f32.mrb[2].mxu1 }
  0xff   : > { %v663_v54 = vpack.c.bf16 %v737_v52, %v736_v48  ;;  %v683_v55 = vpack.c.bf16 %v745_v53, %v744_v49  ;;  %v324_v56 = vpop.f32.mrb[3].mxu0  ;;  %v356_v57 = vpop.f32.mrb[3].mxu1 }
 0x100   : > { %v658_v58 = vpack.c.bf16 %v324_v56, %v321_v50  ;;  %v678_v59 = vpack.c.bf16 %v356_v57, %v353_v51 }
 0x101   : > { %695 = vst [vmem:[%s200_s29 + $0x8] sm:$0xff] %v663_v54   ;;  %699 = vst [vmem:[%s200_s29 + $0x28] sm:$0xff] %v683_v55  }
 0x102   : > { %659 = vst [vmem:[%s200_s29] sm:$0xff] %v658_v58   ;;  %698 = vst [vmem:[%s200_s29 + $0x20] sm:$0xff] %v678_v59  }
 0x104   : > { %v740_v60 = vpop.f32.mrb[4].mxu0  ;;  %v748_v61 = vpop.f32.mrb[4].mxu1 }
 0x105   : > { %v337_v62 = vpop.f32.mrb[5].mxu0  ;;  %v369_v63 = vpop.f32.mrb[5].mxu1 }
 0x106   : > { %v741_v0 = vpop.f32.mrb[6].mxu0  ;;  %v749_v1 = vpop.f32.mrb[6].mxu1 }
 0x107   : > { %v673_v2 = vpack.c.bf16 %v741_v0, %v740_v60  ;;  %v693_v3 = vpack.c.bf16 %v749_v1, %v748_v61  ;;  %v340_v4 = vpop.f32.mrb[7].mxu0  ;;  %v372_v5 = vpop.f32.mrb[7].mxu1 }
 0x108   : > { %v668_v6 = vpack.c.bf16 %v340_v4, %v337_v62  ;;  %v688_v7 = vpack.c.bf16 %v372_v5, %v369_v63 }
 0x109   : > { %697 = vst [vmem:[%s200_s29 + $0x18] sm:$0xff] %v673_v2   ;;  %701 = vst [vmem:[%s200_s29 + $0x38] sm:$0xff] %v693_v3  }
 0x10a   : > { %696 = vst [vmem:[%s200_s29 + $0x10] sm:$0xff] %v668_v6   ;;  %700 = vst [vmem:[%s200_s29 + $0x30] sm:$0xff] %v688_v7  }
 0x10b PF: > { %s12_s11 = sadd.s32 1, %s812_s11   ;;  %s935_s9 = smov %s808_s10 }
 0x10c   : > { %p9_p5 = scmp.ge.s32.totalorder %s12_s11, 4   ;;  %s936_s10 = smov %s938_s12 }
 0x10e   :  { %11 = sbr.rel (!%p9_p5) target bundleno = 2 (0x2), region = 69 }

// kernel: graph_convolution_forward.3
= control target key start
LH: loop header
LB: loop body
LE: loop exit
PB: predicated region body
PF: predicated region fallthrough
CT: control target
= control target key end

     0   :  { %s959_s12 = smov 0   ;;  %s961_s13 = smov 0   ;;  %s1117_s0 = inlined_call_operand.vmem [shape: f32[256,256], index: 0, kind: input, shape index: {}]   ;;  %s1118_s1 = inlined_call_operand.vmem [shape: bf16[256,128], index: 1, kind: input, shape index: {}]   ;;  %s1119_s2 = inlined_call_operand.vmem [shape: f32[1,128], index: 2, kind: input, shape index: {}]   ;;  %s1120_s3 = inlined_call_operand.vmem [shape: f32[256,128], index: 3, kind: output, shape index: {}]  }
   0x1   :  { %s963_s14 = smov 0  }
   0x2 LB: > { %s32_s15 = sadd.s32 1, %s933_s13  ;;  %p768_p0 = scmp.ge.s32.totalorder %s937_s14, 1  ;;  %s937_s14 = sphi %s963_s14, %s13_s14   ;;  %s933_s13 = sphi %s961_s13, %s1122_s13   ;;  %s929_s12 = sphi %s959_s12, %s1121_s12  }
   0x3   : > { %p34_p1 = scmp.ge.s32.totalorder %s32_s15, 2  ;;  %p184_p2 = scmp.lt.s32.totalorder %s937_s14, 3 }
   0x5   : > { %s1124_s15 = smov (%p34_p1, %s32_s15), 0  ;;  %p185_p3 = pnand %p768_p0, %p184_p2 }
   0x6   : > { %v899_v0 = vld [vmem:[%s1118_s1 + $0x40] sm:$0xff] (!%p185_p3)   ;;  %s769_s18 = sshll.u32 (!%p185_p3), %s929_s12, 4  ;;  %v901_v2 = vld [vmem:[%s1118_s1 + $0x48] sm:$0xff] (!%p185_p3)   ;;  %v903_v4 = vld [vmem:[%s1118_s1 + $0x50] sm:$0xff] (!%p185_p3)  }
   0x7   : > { %188 = sbr.rel (%p185_p3) target bundleno = 283 (0x11b), region = 32  ;;  %v900_v1 = vld [vmem:[%s1118_s1] sm:$0xff] (!%p185_p3)   ;;  %794 = vmatprep.subr.bf16.mxu0 (!%p185_p3), %v899_v0  ;;  %858 = vmatprep.subr.bf16.mxu1 (!%p185_p3), %v899_v0  ;;  %p225_p4 = scmp.lt.s32.totalorder (!%p185_p3), %s769_s18, 31  ;;  %v902_v3 = vld [vmem:[%s1118_s1 + $0x8] sm:$0xff] (!%p185_p3)   ;;  %v904_v5 = vld [vmem:[%s1118_s1 + $0x10] sm:$0xff] (!%p185_p3)  }
   0x8   : > { %795 = vmatpush3.bf16.msra.mxu0 (!%p185_p3), %v900_v1  ;;  %866 = vmatpush3.bf16.msra.mxu1 (!%p185_p3), %v900_v1  ;;  %v905_v6 = vld [vmem:[%s1118_s1 + $0x58] sm:$0xff] (!%p185_p3)   ;;  %v907_v8 = vld [vmem:[%s1118_s1 + $0x60] sm:$0xff] (!%p185_p3)   ;;  %v909_v10 = vld [vmem:[%s1118_s1 + $0x68] sm:$0xff] (!%p185_p3)  }
   0x9   : > { %796 = vmatprep.subr.bf16.mxu0 (!%p185_p3), %v901_v2  ;;  %859 = vmatprep.subr.bf16.mxu1 (!%p185_p3), %v901_v2  ;;  %v906_v7 = vld [vmem:[%s1118_s1 + $0x18] sm:$0xff] (!%p185_p3)   ;;  %v908_v9 = vld [vmem:[%s1118_s1 + $0x20] sm:$0xff] (!%p185_p3)   ;;  %v910_v17 = vld [vmem:[%s1118_s1 + $0x28] sm:$0xff] (!%p185_p3)  }
   0xa   : > { %v911_v18 = vld [vmem:[%s1118_s1 + $0x70] sm:$0xff] (!%p185_p3)   ;;  %v913_v20 = vld [vmem:[%s1118_s1 + $0x78] sm:$0xff] (!%p185_p3)  }
   0xb   : > { %v912_v19 = vld [vmem:[%s1118_s1 + $0x30] sm:$0xff] (!%p185_p3)   ;;  %v914_v21 = vld [vmem:[%s1118_s1 + $0x38] sm:$0xff] (!%p185_p3)  }
   0xc   : > { %797 = vmatpush3.bf16.msra.mxu0 (!%p185_p3), %v902_v3  ;;  %867 = vmatpush3.bf16.msra.mxu1 (!%p185_p3), %v902_v3 }
   0xd   : > { %798 = vmatprep.subr.bf16.mxu0 (!%p185_p3), %v903_v4  ;;  %860 = vmatprep.subr.bf16.mxu1 (!%p185_p3), %v903_v4 }
   0xe   : > { %s1126_s18 = smov (!%p225_p4, %s769_s18), 31 }
   0xf   : > { %s793_s4 = sshll.u32 %s1126_s18, 4  ;;  %s773_s30 = sshll.u32 %s1126_s18, 3 }
  0x10   : > { %799 = vmatpush3.bf16.msra.mxu0 %v904_v5  ;;  %868 = vmatpush3.bf16.msra.mxu1 %v904_v5  ;;  %s1010_s11 = scalar_lea.vmem %s1117_s0, %s793_s4  ;;  %s1074_s8 = scalar_lea.vmem %s1120_s3, %s773_s30 }
  0x11   : > { %800 = vmatprep.subr.bf16.mxu0 %v905_v6  ;;  %861 = vmatprep.subr.bf16.mxu1 %v905_v6  ;;  %v273_v11 = vld [vmem:[%s1010_s11 + $0x8] sm:$0xff]  ;;  %v275_v12 = vld [vmem:[%s1010_s11 + $0x18] sm:$0xff]  ;;  %v272_v22 = vld [vmem:[%s1010_s11] sm:$0xff] }
  0x12   : > { %v289_v13 = vld [vmem:[%s1010_s11 + $0x88] sm:$0xff]  ;;  %v305_v14 = vpack.c.bf16 %v275_v12, %v273_v11  ;;  %v291_v15 = vld [vmem:[%s1010_s11 + $0x98] sm:$0xff]  ;;  %v274_v23 = vld [vmem:[%s1010_s11 + $0x10] sm:$0xff] }
  0x13   : > { %v313_v16 = vpack.c.bf16 %v291_v15, %v289_v13  ;;  %v288_v24 = vld [vmem:[%s1010_s11 + $0x80] sm:$0xff]  ;;  %v290_v25 = vld [vmem:[%s1010_s11 + $0x90] sm:$0xff]  ;;  %v277_v26 = vld [vmem:[%s1010_s11 + $0x28] sm:$0xff]  ;;  %v304_v30 = vpack.c.bf16 %v274_v23, %v272_v22 }
  0x14   : > { %801 = vmatpush3.bf16.msra.mxu0 %v906_v7  ;;  %869 = vmatpush3.bf16.msra.mxu1 %v906_v7  ;;  %v279_v27 = vld [vmem:[%s1010_s11 + $0x38] sm:$0xff]  ;;  %v293_v28 = vld [vmem:[%s1010_s11 + $0xa8] sm:$0xff]  ;;  %v312_v31 = vpack.c.bf16 %v290_v25, %v288_v24  ;;  %v276_v34 = vld [vmem:[%s1010_s11 + $0x20] sm:$0xff] }
  0x15   : > { %802 = vmatprep.subr.bf16.mxu0 %v907_v8  ;;  %862 = vmatprep.subr.bf16.mxu1 %v907_v8  ;;  %v295_v29 = vld [vmem:[%s1010_s11 + $0xb8] sm:$0xff]  ;;  %v307_v32 = vpack.c.bf16 %v279_v27, %v277_v26  ;;  %v278_v35 = vld [vmem:[%s1010_s11 + $0x30] sm:$0xff]  ;;  %v292_v36 = vld [vmem:[%s1010_s11 + $0xa0] sm:$0xff] }
  0x16   : > { %496 = vmatprep.mubr.bf16.mxu0 %v305_v14  ;;  %528 = vmatprep.mubr.bf16.mxu1 %v313_v16  ;;  %v315_v33 = vpack.c.bf16 %v295_v29, %v293_v28  ;;  %v294_v37 = vld [vmem:[%s1010_s11 + $0xb0] sm:$0xff]  ;;  %v281_v38 = vld [vmem:[%s1010_s11 + $0x48] sm:$0xff]  ;;  %v283_v39 = vld [vmem:[%s1010_s11 + $0x58] sm:$0xff]  ;;  %v306_v42 = vpack.c.bf16 %v278_v35, %v276_v34 }
  0x17   : > { %v297_v40 = vld [vmem:[%s1010_s11 + $0xc8] sm:$0xff]  ;;  %v299_v41 = vld [vmem:[%s1010_s11 + $0xd8] sm:$0xff]  ;;  %v314_v43 = vpack.c.bf16 %v294_v37, %v292_v36  ;;  %v309_v44 = vpack.c.bf16 %v283_v39, %v281_v38  ;;  %v280_v46 = vld [vmem:[%s1010_s11 + $0x40] sm:$0xff] }
  0x18   : > { %803 = vmatpush3.bf16.msra.mxu0 %v908_v9  ;;  %870 = vmatpush3.bf16.msra.mxu1 %v908_v9  ;;  %v317_v45 = vpack.c.bf16 %v299_v41, %v297_v40  ;;  %v282_v47 = vld [vmem:[%s1010_s11 + $0x50] sm:$0xff]  ;;  %v296_v48 = vld [vmem:[%s1010_s11 + $0xc0] sm:$0xff]  ;;  %v285_v50 = vld [vmem:[%s1010_s11 + $0x68] sm:$0xff] }
  0x19   : > { %804 = vmatprep.subr.bf16.mxu0 %v909_v10  ;;  %863 = vmatprep.subr.bf16.mxu1 %v909_v10  ;;  %v298_v49 = vld [vmem:[%s1010_s11 + $0xd0] sm:$0xff]  ;;  %v287_v51 = vld [vmem:[%s1010_s11 + $0x78] sm:$0xff]  ;;  %v301_v52 = vld [vmem:[%s1010_s11 + $0xe8] sm:$0xff]  ;;  %v308_v54 = vpack.c.bf16 %v282_v47, %v280_v46 }
  0x1a   : > { %v303_v53 = vld [vmem:[%s1010_s11 + $0xf8] sm:$0xff]  ;;  %v316_v55 = vpack.c.bf16 %v298_v49, %v296_v48  ;;  %v311_v56 = vpack.c.bf16 %v287_v51, %v285_v50  ;;  %v284_v58 = vld [vmem:[%s1010_s11 + $0x60] sm:$0xff]  ;;  %v286_v59 = vld [vmem:[%s1010_s11 + $0x70] sm:$0xff] }
  0x1b   : > { %v319_v57 = vpack.c.bf16 %v303_v53, %v301_v52  ;;  %v300_v60 = vld [vmem:[%s1010_s11 + $0xe0] sm:$0xff]  ;;  %v302_v61 = vld [vmem:[%s1010_s11 + $0xf0] sm:$0xff]  ;;  %v310_v62 = vpack.c.bf16 %v286_v59, %v284_v58 }
  0x1c   : > { %805 = vmatpush3.bf16.msra.mxu0 %v910_v17  ;;  %871 = vmatpush3.bf16.msra.mxu1 %v910_v17  ;;  %v318_v63 = vpack.c.bf16 %v302_v61, %v300_v60  ;;  %v1069_v8 = vld [vmem:[%s1119_s2] ss:$0 sm:$0xff] }
  0x1d   : > { %806 = vmatprep.subr.bf16.mxu0 %v911_v18  ;;  %864 = vmatprep.subr.bf16.mxu1 %v911_v18 }
  0x20   : > { %807 = vmatpush3.bf16.msra.mxu0 %v912_v19  ;;  %872 = vmatpush3.bf16.msra.mxu1 %v912_v19 }
  0x21   : > { %808 = vmatprep.subr.bf16.mxu0 %v913_v20  ;;  %865 = vmatprep.subr.bf16.mxu1 %v913_v20 }
  0x24   : > { %809 = vmatpush3.bf16.msra.mxu0 %v914_v21  ;;  %873 = vmatpush3.bf16.msra.mxu1 %v914_v21 }
  0x27   : > { %497 = vmatmul.mubr.bf16.vlgmr.msra.gmra.mrb[0].mxu0 %v304_v30  ;;  %529 = vmatmul.mubr.bf16.vlgmr.msra.gmra.mrb[0].mxu1 %v312_v31 }
  0x28   : > { %504 = vmatprep.mubr.bf16.mxu0 %v307_v32  ;;  %536 = vmatprep.mubr.bf16.mxu1 %v315_v33 }
  0x2f   : > { %505 = vmatmul.mubr.bf16.gmra.mrb[4].mxu0 %v306_v42  ;;  %537 = vmatmul.mubr.bf16.gmra.mrb[4].mxu1 %v314_v43 }
  0x30   : > { %512 = vmatprep.mubr.bf16.mxu0 %v309_v44  ;;  %544 = vmatprep.mubr.bf16.mxu1 %v317_v45 }
  0x37   : > { %513 = vmatmul.mubr.bf16.gmra.mrb[8].mxu0 %v308_v54  ;;  %545 = vmatmul.mubr.bf16.gmra.mrb[8].mxu1 %v316_v55 }
  0x38   : > { %520 = vmatprep.mubr.bf16.mxu0 %v311_v56  ;;  %552 = vmatprep.mubr.bf16.mxu1 %v319_v57 }
  0x3f   : > { %521 = vmatmul.mubr.bf16.gmra.mrb[12].mxu0 %v310_v62  ;;  %553 = vmatmul.mubr.bf16.gmra.mrb[12].mxu1 %v318_v63 }
  0xfa   : > { %v810_v0 = vpop.f32.mrb[0].mxu0  ;;  %v834_v1 = vpop.f32.mrb[0].mxu1 }
  0xfb   : > { %v811_v2 = vpop.f32.mrb[1].mxu0  ;;  %v835_v3 = vpop.f32.mrb[1].mxu1 }
  0xfc   : > { %v812_v4 = vadd.f32 %v811_v2, %v810_v0  ;;  %v836_v5 = vadd.f32 %v835_v3, %v834_v1  ;;  %v813_v6 = vpop.f32.mrb[2].mxu0  ;;  %v837_v7 = vpop.f32.mrb[2].mxu1 }
  0xfd   : > { %v814_v9 = vpop.f32.mrb[3].mxu0  ;;  %v838_v10 = vpop.f32.mrb[3].mxu1 }
  0xfe   : > { %v815_v11 = vadd.f32 %v814_v9, %v813_v6  ;;  %v839_v12 = vadd.f32 %v838_v10, %v837_v7  ;;  %v619_v13 = vadd.f32 %v812_v4, %v1069_v8  ;;  %v627_v14 = vadd.f32 %v836_v5, %v1069_v8 }
 0x100   : > { %635 = vst [vmem:[%s1074_s8] sm:$0xff] %v619_v13  ;;  %643 = vst [vmem:[%s1074_s8 + $0x40] sm:$0xff] %v627_v14  ;;  %v620_v15 = vadd.f32 %v815_v11, %v1069_v8  ;;  %v628_v16 = vadd.f32 %v839_v12, %v1069_v8 }
 0x102   : > { %v816_v17 = vpop.f32.mrb[4].mxu0  ;;  %v840_v18 = vpop.f32.mrb[4].mxu1  ;;  %636 = vst [vmem:[%s1074_s8 + $0x8] sm:$0xff] %v620_v15  ;;  %644 = vst [vmem:[%s1074_s8 + $0x48] sm:$0xff] %v628_v16 }
 0x103   : > { %v817_v19 = vpop.f32.mrb[5].mxu0  ;;  %v841_v20 = vpop.f32.mrb[5].mxu1 }
 0x104   : > { %v818_v21 = vadd.f32 %v817_v19, %v816_v17  ;;  %v842_v22 = vadd.f32 %v841_v20, %v840_v18  ;;  %v819_v23 = vpop.f32.mrb[6].mxu0  ;;  %v843_v24 = vpop.f32.mrb[6].mxu1 }
 0x105   : > { %v820_v25 = vpop.f32.mrb[7].mxu0  ;;  %v844_v26 = vpop.f32.mrb[7].mxu1 }
 0x106   : > { %v821_v27 = vadd.f32 %v820_v25, %v819_v23  ;;  %v845_v28 = vadd.f32 %v844_v26, %v843_v24  ;;  %v621_v29 = vadd.f32 %v818_v21, %v1069_v8  ;;  %v629_v30 = vadd.f32 %v842_v22, %v1069_v8 }
 0x108   : > { %637 = vst [vmem:[%s1074_s8 + $0x10] sm:$0xff] %v621_v29  ;;  %645 = vst [vmem:[%s1074_s8 + $0x50] sm:$0xff] %v629_v30  ;;  %v622_v31 = vadd.f32 %v821_v27, %v1069_v8  ;;  %v630_v32 = vadd.f32 %v845_v28, %v1069_v8 }
 0x10a   : > { %v822_v33 = vpop.f32.mrb[8].mxu0  ;;  %v846_v34 = vpop.f32.mrb[8].mxu1  ;;  %638 = vst [vmem:[%s1074_s8 + $0x18] sm:$0xff] %v622_v31  ;;  %646 = vst [vmem:[%s1074_s8 + $0x58] sm:$0xff] %v630_v32 }
 0x10b   : > { %v823_v35 = vpop.f32.mrb[9].mxu0  ;;  %v847_v36 = vpop.f32.mrb[9].mxu1 }
 0x10c   : > { %v824_v37 = vadd.f32 %v823_v35, %v822_v33  ;;  %v848_v38 = vadd.f32 %v847_v36, %v846_v34  ;;  %v825_v39 = vpop.f32.mrb[10].mxu0  ;;  %v849_v40 = vpop.f32.mrb[10].mxu1 }
 0x10d   : > { %v826_v41 = vpop.f32.mrb[11].mxu0  ;;  %v850_v42 = vpop.f32.mrb[11].mxu1 }
 0x10e   : > { %v827_v43 = vadd.f32 %v826_v41, %v825_v39  ;;  %v851_v44 = vadd.f32 %v850_v42, %v849_v40  ;;  %v623_v45 = vadd.f32 %v824_v37, %v1069_v8  ;;  %v631_v46 = vadd.f32 %v848_v38, %v1069_v8 }
 0x110   : > { %639 = vst [vmem:[%s1074_s8 + $0x20] sm:$0xff] %v623_v45  ;;  %647 = vst [vmem:[%s1074_s8 + $0x60] sm:$0xff] %v631_v46  ;;  %v624_v47 = vadd.f32 %v827_v43, %v1069_v8  ;;  %v632_v48 = vadd.f32 %v851_v44, %v1069_v8 }
 0x112   : > { %v828_v49 = vpop.f32.mrb[12].mxu0  ;;  %v852_v50 = vpop.f32.mrb[12].mxu1  ;;  %640 = vst [vmem:[%s1074_s8 + $0x28] sm:$0xff] %v624_v47  ;;  %648 = vst [vmem:[%s1074_s8 + $0x68] sm:$0xff] %v632_v48 }
 0x113   : > { %v829_v51 = vpop.f32.mrb[13].mxu0  ;;  %v853_v52 = vpop.f32.mrb[13].mxu1 }
 0x114   : > { %v830_v53 = vadd.f32 %v829_v51, %v828_v49  ;;  %v854_v54 = vadd.f32 %v853_v52, %v852_v50  ;;  %v831_v55 = vpop.f32.mrb[14].mxu0  ;;  %v855_v56 = vpop.f32.mrb[14].mxu1 }
 0x115   : > { %v832_v57 = vpop.f32.mrb[15].mxu0  ;;  %v856_v58 = vpop.f32.mrb[15].mxu1 }
 0x116   : > { %v833_v59 = vadd.f32 %v832_v57, %v831_v55  ;;  %v857_v60 = vadd.f32 %v856_v58, %v855_v56  ;;  %v625_v61 = vadd.f32 %v830_v53, %v1069_v8  ;;  %v633_v62 = vadd.f32 %v854_v54, %v1069_v8 }
 0x118   : > { %641 = vst [vmem:[%s1074_s8 + $0x30] sm:$0xff] %v625_v61  ;;  %649 = vst [vmem:[%s1074_s8 + $0x70] sm:$0xff] %v633_v62  ;;  %v626_v63 = vadd.f32 %v833_v59, %v1069_v8  ;;  %v634_v0 = vadd.f32 %v857_v60, %v1069_v8 }
 0x11a   : > { %642 = vst [vmem:[%s1074_s8 + $0x38] sm:$0xff] %v626_v63  ;;  %650 = vst [vmem:[%s1074_s8 + $0x78] sm:$0xff] %v634_v0 }
 0x11b PF: > { %s13_s14 = sadd.s32 1, %s937_s14   ;;  %s1121_s12 = smov %s933_s13 }
 0x11c   : > { %p10_p5 = scmp.ge.s32.totalorder %s13_s14, 4   ;;  %s1122_s13 = smov %s1124_s15 }
 0x11e   :  { %12 = sbr.rel (!%p10_p5) target bundleno = 2 (0x2), region = 76 }

</bundles_post_ra>
